<compile_context>
chip_gen: v5e
topology: v5e:2x2
jax: 0.10.0
libtpu: 0.0.40
codegen_flags: <defaults>
</compile_context>

<pallas_src>
import functools

import jax
import jax.numpy as jnp
from jax.experimental import pallas as pl
from jax.experimental.pallas import tpu as pltpu

_LANE = 128  # vreg lane width


def _round_up(x, m):
    return (x + m - 1) // m * m


def _sigmoid(v):
    # sigmoid(x) == 0.5 * tanh(0.5 * x) + 0.5  -> single EUP (tanh) push per gate.
    return 0.5 * jnp.tanh(0.5 * v) + 0.5


def _split_gates(gates, hp, gn):
    """Split [M, 4*hp] gate-interleaved gates into (i, f, g, o), each [M, hp]."""
    m = gates.shape[0]
    nj = hp // gn
    if nj == 1:
        return tuple(gates[:, g * hp:(g + 1) * hp] for g in range(4))
    g4 = gates.reshape(m, nj, 4, gn)
    return tuple(g4[:, :, g, :].reshape(m, hp) for g in range(4))


def _resident_spec(shape, index_map, resident):
    """BlockSpec; single-buffered (pl.Buffered(1)) when the block is grid-invariant."""
    if resident:
        try:
            return pl.BlockSpec(shape, index_map, pipeline_mode=pl.Buffered(1))
        except Exception:  # pragma: no cover - API without pipeline_mode
            pass
    return pl.BlockSpec(shape, index_map)


def _vmem_limit_bytes():
    try:
        phys = pltpu.get_tpu_info().vmem_capacity_bytes
        return int(phys * 3 // 4)   # ~96 MiB on v5e/v6e (128), ~48 MiB on v7x (64)
    except Exception:
        return 48 * 1024 * 1024


def _pick_batch_tile(b, cap=256):
    """Batch tile (multiple of 8 sublanes) minimising padded rows, capped at 256."""
    b8 = _round_up(b, 8)
    if b8 <= cap:
        return b8
    best_tm, best_pad = cap, _round_up(b8, cap) - b8
    for tm in (256, 128, 64, 32, 16, 8):
        if tm > cap:
            continue
        pad = _round_up(b8, tm) - b8
        if pad < best_pad:
            best_tm, best_pad = tm, pad
    return best_tm


def _pick_gate_tile(hp, max_gn=512):
    """Gate/hidden column tile: multiple of 128 that divides Hp, at most max_gn."""
    n128 = hp // _LANE
    for g in range(min(n128, max_gn // _LANE), 0, -1):
        if n128 % g == 0:
            return _LANE * g
    return _LANE


# ------------------------------- kernels -----------------------------------


def _lstm_cell_kernel(x_ref, h_ref, wx_ref, wh_ref, b_ref, c_ref, hy_ref, cy_ref):
    """One (batch tile, hidden-column tile): gates = x@wx + h@wh + b -> LSTM update."""
    gn = cy_ref.shape[-1]
    gates = (
        jnp.dot(x_ref[...], wx_ref[...], preferred_element_type=jnp.float32)
        + jnp.dot(h_ref[...], wh_ref[...], preferred_element_type=jnp.float32)
        + b_ref[...]
    )
    ingate, forgetgate, cellgate, outgate = _split_gates(gates, gn, gn)
    ingate, forgetgate, outgate = _sigmoid(ingate), _sigmoid(forgetgate), _sigmoid(outgate)
    cellgate = jnp.tanh(cellgate)

    cy = forgetgate * c_ref[...].astype(jnp.float32) + ingate * cellgate
    hy_ref[...] = (outgate * jnp.tanh(cy)).astype(hy_ref.dtype)
    cy_ref[...] = cy                      # cy output is f32


def _lstm_cell_kernel_zero_state(x_ref, wx_ref, b_ref, hy_ref, cy_ref):
    """hx is None (h == c == 0): skip the recurrent matmul and the forget term."""
    gn = cy_ref.shape[-1]
    gates = jnp.dot(x_ref[...], wx_ref[...], preferred_element_type=jnp.float32) + b_ref[...]
    ingate, _, cellgate, outgate = _split_gates(gates, gn, gn)

    cy = _sigmoid(ingate) * jnp.tanh(cellgate)
    hy_ref[...] = (_sigmoid(outgate) * jnp.tanh(cy)).astype(hy_ref.dtype)
    cy_ref[...] = cy


def _lstm_seq_kernel(x_ref, wx_ref, wh_ref, b_ref, h0_ref, c0_ref,
                     ys_ref, cT_ref, h_sc, c_sc, *, gn):
    """Grid over T ('arbitrary'); weights resident; h/c carried in VMEM scratch."""
    t = pl.program_id(0)
    hp = c_sc.shape[-1]

    @pl.when(t == 0)
    def _init():
        h_sc[...] = h0_ref[...]
        c_sc[...] = c0_ref[...]

    gates = (
        jnp.dot(x_ref[0], wx_ref[...], preferred_element_type=jnp.float32)
        + jnp.dot(h_sc[...], wh_ref[...], preferred_element_type=jnp.float32)
        + b_ref[...]
    )
    ingate, forgetgate, cellgate, outgate = _split_gates(gates, hp, gn)
    ingate, forgetgate, outgate = _sigmoid(ingate), _sigmoid(forgetgate), _sigmoid(outgate)
    cellgate = jnp.tanh(cellgate)

    cy = forgetgate * c_sc[...] + ingate * cellgate
    hy = outgate * jnp.tanh(cy)

    c_sc[...] = cy                                 # f32 cell state carried in VMEM
    h_sc[...] = hy.astype(h_sc.dtype)
    ys_ref[0] = hy.astype(ys_ref.dtype)
    cT_ref[...] = cy                               # resident block; final value flushed


# ------------------------------ wrappers ------------------------------------


def prepare_lstm_params(params, compute_dtype=jnp.bfloat16, max_gate_tile=512):
    """One-time weight prep: transpose, lane-pad K & H, gate-interleave, pre-sum bias.

    params: (w_ih [4H,In], b_ih [4H], w_hh [4H,H], b_hh [4H])  (PyTorch layout).
    """
    w_ih, b_ih, w_hh, b_hh = params
    inp = int(w_ih.shape[1])
    h = int(w_hh.shape[1])
    hp = _round_up(h, _LANE)
    kx = _round_up(inp, _LANE)
    gn = _pick_gate_tile(hp, max_gate_tile)
    nj = hp // gn

    def relayout(w_t, k_rows, k_pad):
        # [k_rows, 4H] -> zero-pad -> gate-interleaved [k_pad, 4*Hp]
        # column index = j*(4*GN) + gate*GN + t   (hidden tile j, lane t)
        w4 = w_t.reshape(k_rows, 4, h)
        w4 = jnp.pad(w4, ((0, k_pad - k_rows), (0, 0), (0, hp - h)))
        w4 = w4.reshape(k_pad, 4, nj, gn).transpose(0, 2, 1, 3)
        return w4.reshape(k_pad, 4 * hp).astype(compute_dtype)

    w_x = relayout(w_ih.T, inp, kx)     # [Kx, 4*Hp]
    w_h = relayout(w_hh.T, h, hp)       # [Hp, 4*Hp]

    bias = (b_ih + b_hh).astype(jnp.float32).reshape(4, h)
    bias = jnp.pad(bias, ((0, 0), (0, hp - h)))
    bias = bias.reshape(4, nj, gn).transpose(1, 0, 2).reshape(1, 4 * hp)

    return {
        "w_x": w_x, "w_h": w_h, "bias": bias,
        "In": inp, "H": h, "Hp": hp, "Kx": kx, "GN": gn,
        "compute_dtype": compute_dtype,
    }


def lstm_cell(x, hx, prepared):
    """x: [B, In]; hx: None or (h [B,H], c [B,H]). Returns (hy [B,H] x.dtype, cy [B,H] f32)."""
    inp, h_dim = prepared["In"], prepared["H"]
    hp, kx, gn = prepared["Hp"], prepared["Kx"], prepared["GN"]
    cdt = prepared["compute_dtype"]
    b = x.shape[0]
    out_dtype = x.dtype

    tm = _pick_batch_tile(b)
    bp = _round_up(b, tm)
    n_i, n_j = bp // tm, hp // gn
    resident = n_j == 1            # weight/bias blocks are grid-invariant -> Buffered(1)

    xin = jnp.pad(x.astype(cdt), ((0, bp - b), (0, kx - inp)))

    if hx is None:
        kernel = _lstm_cell_kernel_zero_state
        inputs = (xin, prepared["w_x"], prepared["bias"])
        in_specs = [
            pl.BlockSpec((tm, kx), lambda i, j: (i, 0)),
            _resident_spec((kx, 4 * gn), lambda i, j: (0, j), resident),
            _resident_spec((1, 4 * gn), lambda i, j: (0, j), resident),
        ]
        flops = 2 * bp * kx * 4 * hp
    else:
        h0, c0 = hx
        hin = jnp.pad(h0.astype(cdt), ((0, bp - b), (0, hp - h_dim)))
        cin = jnp.pad(c0, ((0, bp - b), (0, hp - h_dim)))   # cast to f32 inside kernel
        kernel = _lstm_cell_kernel
        inputs = (xin, hin, prepared["w_x"], prepared["w_h"], prepared["bias"], cin)
        in_specs = [
            pl.BlockSpec((tm, kx), lambda i, j: (i, 0)),
            pl.BlockSpec((tm, hp), lambda i, j: (i, 0)),
            _resident_spec((kx, 4 * gn), lambda i, j: (0, j), resident),
            _resident_spec((hp, 4 * gn), lambda i, j: (0, j), resident),
            _resident_spec((1, 4 * gn), lambda i, j: (0, j), resident),
            pl.BlockSpec((tm, gn), lambda i, j: (i, j)),
        ]
        flops = 2 * bp * (kx + hp) * 4 * hp

    in_bytes = sum(int(a.size) * a.dtype.itemsize for a in inputs)
    out_bytes = bp * hp * (jnp.dtype(out_dtype).itemsize + 4)
    cost = pl.CostEstimate(flops=int(flops),
                           transcendentals=int(5 * bp * hp),
                           bytes_accessed=int(in_bytes + out_bytes))

    hy, cy = pl.pallas_call(
        kernel,
        out_shape=(jax.ShapeDtypeStruct((bp, hp), out_dtype),
                   jax.ShapeDtypeStruct((bp, hp), jnp.float32)),   # cy kept in f32
        grid=(n_i, n_j),
        in_specs=in_specs,
        out_specs=(pl.BlockSpec((tm, gn), lambda i, j: (i, j)),
                   pl.BlockSpec((tm, gn), lambda i, j: (i, j))),
        compiler_params=pltpu.CompilerParams(
            dimension_semantics=("parallel", "parallel"),
            vmem_limit_bytes=_vmem_limit_bytes(),
        ),
        cost_estimate=cost,
    )(*inputs)

    return hy[:b, :h_dim], cy[:b, :h_dim]


def lstm_seq(xs, hx, prepared):
    """xs: [T, B, In]; hx: None or (h0, c0). Returns (ys [T,B,H], (h_T, c_T)).

    Weights are loaded from HBM once per sequence (resident, single-buffered);
    the recurrent state lives in VMEM scratch across the T grid steps.
    """
    t_len, b, inp = xs.shape
    h_dim, hp, kx, gn = prepared["H"], prepared["Hp"], prepared["Kx"], prepared["GN"]
    cdt = prepared["compute_dtype"]
    out_dtype = xs.dtype
    bp = _round_up(b, 8)

    xin = jnp.pad(xs.astype(cdt), ((0, 0), (0, bp - b), (0, kx - inp)))
    if hx is None:
        h0 = jnp.zeros((bp, hp), cdt)
        c0 = jnp.zeros((bp, hp), jnp.float32)
    else:
        h0 = jnp.pad(hx[0].astype(cdt), ((0, bp - b), (0, hp - h_dim)))
        c0 = jnp.pad(hx[1].astype(jnp.float32), ((0, bp - b), (0, hp - h_dim)))

    const2d = lambda t: (0, 0)
    cost = pl.CostEstimate(
        flops=int(2 * t_len * bp * (kx + hp) * 4 * hp),
        transcendentals=int(5 * t_len * bp * hp),
        bytes_accessed=int(xin.size * xin.dtype.itemsize
                           + prepared["w_x"].size * prepared["w_x"].dtype.itemsize
                           + prepared["w_h"].size * prepared["w_h"].dtype.itemsize
                           + t_len * bp * hp * jnp.dtype(out_dtype).itemsize
                           + bp * hp * 4),
    )

    ys, c_t = pl.pallas_call(
        functools.partial(_lstm_seq_kernel, gn=gn),
        out_shape=(jax.ShapeDtypeStruct((t_len, bp, hp), out_dtype),
                   jax.ShapeDtypeStruct((bp, hp), jnp.float32)),
        grid=(t_len,),
        in_specs=[
            pl.BlockSpec((1, bp, kx), lambda t: (t, 0, 0)),
            _resident_spec((kx, 4 * hp), const2d, True),
            _resident_spec((hp, 4 * hp), const2d, True),
            _resident_spec((1, 4 * hp), const2d, True),
            _resident_spec((bp, hp), const2d, True),
            _resident_spec((bp, hp), const2d, True),
        ],
        out_specs=(pl.BlockSpec((1, bp, hp), lambda t: (t, 0, 0)),
                   pl.BlockSpec((bp, hp), const2d)),
        scratch_shapes=[pltpu.VMEM((bp, hp), cdt),          # h carry
                        pltpu.VMEM((bp, hp), jnp.float32)],  # c carry (f32)
        compiler_params=pltpu.CompilerParams(
            dimension_semantics=("arbitrary",),
            vmem_limit_bytes=_vmem_limit_bytes(),
        ),
        cost_estimate=cost,
    )(xin, prepared["w_x"], prepared["w_h"], prepared["bias"], h0, c0)

    ys = ys[:, :b, :h_dim]
    return ys, (ys[-1], c_t[:b, :h_dim])


# ------------------------- reference & init ---------------------------------


def init_lstm_params(key, input_size, hidden_size, dtype=jnp.float32):
    """Matches LSTMCell.reset_parameters(): uniform(-stdv, stdv)."""
    stdv = 1.0 / hidden_size ** 0.5
    k1, k2, k3, k4 = jax.random.split(key, 4)
    u = lambda k, shape: jax.random.uniform(k, shape, dtype, -stdv, stdv)
    w_ih = u(k1, (4 * hidden_size, input_size))
    b_ih = u(k2, (4 * hidden_size,))
    w_hh = u(k3, (4 * hidden_size, hidden_size))
    b_hh = u(k4, (4 * hidden_size,))
    return w_ih, b_ih, w_hh, b_hh


def lstm_cell_ref(x, hx, params):
    """Pure-JAX reference mirroring the PyTorch forward."""
    w_ih, b_ih, w_hh, b_hh = params
    b = x.shape[0]
    h_dim = w_hh.shape[1]
    if hx is None:
        h0 = jnp.zeros((b, h_dim), x.dtype)
        c0 = jnp.zeros((b, h_dim), x.dtype)
    else:
        h0, c0 = hx
    gates = x @ w_ih.T + b_ih + h0 @ w_hh.T + b_hh
    i, f, g, o = jnp.split(gates, 4, axis=1)
    i, f, g, o = jax.nn.sigmoid(i), jax.nn.sigmoid(f), jnp.tanh(g), jax.nn.sigmoid(o)
    cy = f * c0 + i * g
    hy = o * jnp.tanh(cy)
    return hy, cy


def lstm_seq_ref(xs, hx, params):
    state, outs = hx, []
    hy = cy = None
    for t in range(xs.shape[0]):
        hy, cy = lstm_cell_ref(xs[t], state, params)
        state = (hy, cy)
        outs.append(hy)
    return jnp.stack(outs), (hy, cy)


if __name__ == "__main__":
    key = jax.random.PRNGKey(0)
    k_param, k_x, k_h, k_c, k_seq = jax.random.split(key, 5)

    B, INPUT_SIZE, HIDDEN_SIZE, T = 8, 16, 32, 6
    params = init_lstm_params(k_param, INPUT_SIZE, HIDDEN_SIZE)

    x = jax.random.normal(k_x, (B, INPUT_SIZE), jnp.float32)
    h0 = jax.random.normal(k_h, (B, HIDDEN_SIZE), jnp.float32)
    c0 = jax.random.normal(k_c, (B, HIDDEN_SIZE), jnp.float32)
    xs = jax.random.normal(k_seq, (T, B, INPUT_SIZE), jnp.float32)

    # --- f32 MXU operands: exact check against the reference ---
    prep_f32 = prepare_lstm_params(params, compute_dtype=jnp.float32)

    hy, cy = lstm_cell(x, (h0, c0), prep_f32)
    jax.block_until_ready((hy, cy))
    hy_ref, cy_ref = lstm_cell_ref(x, (h0, c0), params)
    assert jnp.allclose(hy, hy_ref, atol=1e-4), "hy mismatch"
    assert jnp.allclose(cy, cy_ref, atol=1e-4), "cy mismatch"

    hy2, cy2 = lstm_cell(x, None, prep_f32)
    jax.block_until_ready((hy2, cy2))
    hy2_ref, cy2_ref = lstm_cell_ref(x, None, params)
    assert jnp.allclose(hy2, hy2_ref, atol=1e-4), "hy (hx=None) mismatch"
    assert jnp.allclose(cy2, cy2_ref, atol=1e-4), "cy (hx=None) mismatch"

    # --- bf16 MXU operands (default): f32 accumulation / activations / cell state ---
    prep_bf16 = prepare_lstm_params(params)        # compute_dtype=bf16 by default
    hy3, cy3 = lstm_cell(x, (h0, c0), prep_bf16)
    jax.block_until_ready((hy3, cy3))
    assert jnp.allclose(hy3, hy_ref, atol=5e-2), "hy (bf16) mismatch"
    assert jnp.allclose(cy3, cy_ref, atol=5e-2), "cy (bf16) mismatch"

    # --- sequence kernel: timestep loop folded in, weights loaded once per sequence ---
    ys, (h_t, c_t) = lstm_seq(xs, (h0, c0), prep_f32)
    jax.block_until_ready((ys, h_t, c_t))
    ys_ref, (h_t_ref, c_t_ref) = lstm_seq_ref(xs, (h0, c0), params)
    assert jnp.allclose(ys, ys_ref, atol=1e-3), "ys (seq) mismatch"
    assert jnp.allclose(c_t, c_t_ref, atol=1e-3), "c_T (seq) mismatch"

    ys0, _ = lstm_seq(xs, None, prep_f32)
    jax.block_until_ready(ys0)
    ys0_ref, _ = lstm_seq_ref(xs, None, params)
    assert jnp.allclose(ys0, ys0_ref, atol=1e-3), "ys (seq, hx=None) mismatch"

    print("KERNEL_OK")
</pallas_src>

<mosaic_0001>
module attributes {stable_mosaic.version = 11 : i64} {
  func.func @_lstm_cell_kernel(%arg0: i32, %arg1: i32, %arg2: memref<8x128xf32, #tpu.memory_space<vmem>>, %arg3: memref<8x128xf32, #tpu.memory_space<vmem>>, %arg4: memref<128x512xf32, #tpu.memory_space<vmem>>, %arg5: memref<128x512xf32, #tpu.memory_space<vmem>>, %arg6: memref<1x512xf32, #tpu.memory_space<vmem>>, %arg7: memref<8x128xf32, #tpu.memory_space<vmem>>, %arg8: memref<8x128xf32, #tpu.memory_space<vmem>>, %arg9: memref<8x128xf32, #tpu.memory_space<vmem>>) attributes {dimension_semantics = [#tpu.dimension_semantics<parallel>, #tpu.dimension_semantics<parallel>], iteration_bounds = array<i64: 1, 1>, scalar_prefetch = 0 : i64, scratch_operands = 0 : i64, tpu.core_type = #tpu.core_type<tc>, window_params = [{transform_indices = @transform_0, window_bounds = array<i64: 8, 128>}, {transform_indices = @transform_1, window_bounds = array<i64: 8, 128>}, {pipeline_mode = #tpu.pipeline_mode<synchronous>, transform_indices = @transform_2, window_bounds = array<i64: 128, 512>}, {pipeline_mode = #tpu.pipeline_mode<synchronous>, transform_indices = @transform_3, window_bounds = array<i64: 128, 512>}, {pipeline_mode = #tpu.pipeline_mode<synchronous>, transform_indices = @transform_4, window_bounds = array<i64: 1, 512>}, {transform_indices = @transform_5, window_bounds = array<i64: 8, 128>}, {transform_indices = @transform_6, window_bounds = array<i64: 8, 128>}, {transform_indices = @transform_7, window_bounds = array<i64: 8, 128>}]} {
    %c0 = arith.constant 0 : index
    %c0_0 = arith.constant 0 : index
    %0 = vector.load %arg2[%c0, %c0_0] : memref<8x128xf32, #tpu.memory_space<vmem>>, vector<8x128xf32>
    %c0_1 = arith.constant 0 : index
    %c0_2 = arith.constant 0 : index
    %1 = vector.load %arg4[%c0_1, %c0_2] : memref<128x512xf32, #tpu.memory_space<vmem>>, vector<128x512xf32>
    %cst = arith.constant dense<0.000000e+00> : vector<8x512xf32>
    %2 = tpu.matmul %0, %1, %cst {dimension_numbers = #tpu.dot_dimension_numbers<[1], [0], [0], [1], [0, 0, 1, 1], [], []>} : vector<8x128xf32>, vector<128x512xf32>, vector<8x512xf32> -> vector<8x512xf32>
    %c0_3 = arith.constant 0 : index
    %c0_4 = arith.constant 0 : index
    %3 = vector.load %arg3[%c0_3, %c0_4] : memref<8x128xf32, #tpu.memory_space<vmem>>, vector<8x128xf32>
    %c0_5 = arith.constant 0 : index
    %c0_6 = arith.constant 0 : index
    %4 = vector.load %arg5[%c0_5, %c0_6] : memref<128x512xf32, #tpu.memory_space<vmem>>, vector<128x512xf32>
    %cst_7 = arith.constant dense<0.000000e+00> : vector<8x512xf32>
    %5 = tpu.matmul %3, %4, %cst_7 {dimension_numbers = #tpu.dot_dimension_numbers<[1], [0], [0], [1], [0, 0, 1, 1], [], []>} : vector<8x128xf32>, vector<128x512xf32>, vector<8x512xf32> -> vector<8x512xf32>
    %6 = arith.addf %2, %5 : vector<8x512xf32>
    %c0_8 = arith.constant 0 : index
    %c0_9 = arith.constant 0 : index
    %7 = vector.load %arg6[%c0_8, %c0_9] : memref<1x512xf32, #tpu.memory_space<vmem>>, vector<1x512xf32>
    %8 = vector.broadcast %7 : vector<1x512xf32> to vector<8x512xf32>
    %9 = arith.addf %6, %8 : vector<8x512xf32>
    %10 = vector.extract_strided_slice %9 {offsets = [0, 0], sizes = [8, 128], strides = [1, 1]} : vector<8x512xf32> to vector<8x128xf32>
    %11 = vector.extract_strided_slice %9 {offsets = [0, 128], sizes = [8, 128], strides = [1, 1]} : vector<8x512xf32> to vector<8x128xf32>
    %12 = vector.extract_strided_slice %9 {offsets = [0, 256], sizes = [8, 128], strides = [1, 1]} : vector<8x512xf32> to vector<8x128xf32>
    %13 = vector.extract_strided_slice %9 {offsets = [0, 384], sizes = [8, 128], strides = [1, 1]} : vector<8x512xf32> to vector<8x128xf32>
    %cst_10 = arith.constant 5.000000e-01 : f32
    %14 = vector.broadcast %cst_10 : f32 to vector<8x128xf32>
    %15 = arith.mulf %14, %10 : vector<8x128xf32>
    %16 = math.tanh %15 : vector<8x128xf32>
    %cst_11 = arith.constant 5.000000e-01 : f32
    %17 = vector.broadcast %cst_11 : f32 to vector<8x128xf32>
    %18 = arith.mulf %17, %16 : vector<8x128xf32>
    %cst_12 = arith.constant 5.000000e-01 : f32
    %19 = vector.broadcast %cst_12 : f32 to vector<8x128xf32>
    %20 = arith.addf %18, %19 : vector<8x128xf32>
    %cst_13 = arith.constant 5.000000e-01 : f32
    %21 = vector.broadcast %cst_13 : f32 to vector<8x128xf32>
    %22 = arith.mulf %21, %11 : vector<8x128xf32>
    %23 = math.tanh %22 : vector<8x128xf32>
    %cst_14 = arith.constant 5.000000e-01 : f32
    %24 = vector.broadcast %cst_14 : f32 to vector<8x128xf32>
    %25 = arith.mulf %24, %23 : vector<8x128xf32>
    %cst_15 = arith.constant 5.000000e-01 : f32
    %26 = vector.broadcast %cst_15 : f32 to vector<8x128xf32>
    %27 = arith.addf %25, %26 : vector<8x128xf32>
    %cst_16 = arith.constant 5.000000e-01 : f32
    %28 = vector.broadcast %cst_16 : f32 to vector<8x128xf32>
    %29 = arith.mulf %28, %13 : vector<8x128xf32>
    %30 = math.tanh %29 : vector<8x128xf32>
    %cst_17 = arith.constant 5.000000e-01 : f32
    %31 = vector.broadcast %cst_17 : f32 to vector<8x128xf32>
    %32 = arith.mulf %31, %30 : vector<8x128xf32>
    %cst_18 = arith.constant 5.000000e-01 : f32
    %33 = vector.broadcast %cst_18 : f32 to vector<8x128xf32>
    %34 = arith.addf %32, %33 : vector<8x128xf32>
    %35 = math.tanh %12 : vector<8x128xf32>
    %c0_19 = arith.constant 0 : index
    %c0_20 = arith.constant 0 : index
    %36 = vector.load %arg7[%c0_19, %c0_20] : memref<8x128xf32, #tpu.memory_space<vmem>>, vector<8x128xf32>
    %37 = arith.mulf %27, %36 : vector<8x128xf32>
    %38 = arith.mulf %20, %35 : vector<8x128xf32>
    %39 = arith.addf %37, %38 : vector<8x128xf32>
    %40 = math.tanh %39 : vector<8x128xf32>
    %41 = arith.mulf %34, %40 : vector<8x128xf32>
    %c0_21 = arith.constant 0 : index
    %c0_22 = arith.constant 0 : index
    %42 = vector.load %arg8[%c0_21, %c0_22] : memref<8x128xf32, #tpu.memory_space<vmem>>, vector<8x128xf32>
    tpu.vector_store %arg8[%c0_21, %c0_22], %41 {strides = array<i32>} : memref<8x128xf32, #tpu.memory_space<vmem>>, vector<8x128xf32>,
    %c0_23 = arith.constant 0 : index
    %c0_24 = arith.constant 0 : index
    %43 = vector.load %arg9[%c0_23, %c0_24] : memref<8x128xf32, #tpu.memory_space<vmem>>, vector<8x128xf32>
    tpu.vector_store %arg9[%c0_23, %c0_24], %39 {strides = array<i32>} : memref<8x128xf32, #tpu.memory_space<vmem>>, vector<8x128xf32>,
    return
  }
  func.func @transform_0(%arg0: i32, %arg1: i32) -> (i32, i32) {
    %c0_i32 = arith.constant 0 : i32
    %c0_i32_0 = arith.constant 0 : i32
    return %arg0, %c0_i32 : i32, i32
  }
  func.func @transform_1(%arg0: i32, %arg1: i32) -> (i32, i32) {
    %c0_i32 = arith.constant 0 : i32
    %c0_i32_0 = arith.constant 0 : i32
    return %arg0, %c0_i32 : i32, i32
  }
  func.func @transform_2(%arg0: i32, %arg1: i32) -> (i32, i32) {
    %c0_i32 = arith.constant 0 : i32
    %c0_i32_0 = arith.constant 0 : i32
    return %c0_i32, %arg1 : i32, i32
  }
  func.func @transform_3(%arg0: i32, %arg1: i32) -> (i32, i32) {
    %c0_i32 = arith.constant 0 : i32
    %c0_i32_0 = arith.constant 0 : i32
    return %c0_i32, %arg1 : i32, i32
  }
  func.func @transform_4(%arg0: i32, %arg1: i32) -> (i32, i32) {
    %c0_i32 = arith.constant 0 : i32
    %c0_i32_0 = arith.constant 0 : i32
    return %c0_i32, %arg1 : i32, i32
  }
  func.func @transform_5(%arg0: i32, %arg1: i32) -> (i32, i32) {
    %c0_i32 = arith.constant 0 : i32
    return %arg0, %arg1 : i32, i32
  }
  func.func @transform_6(%arg0: i32, %arg1: i32) -> (i32, i32) {
    %c0_i32 = arith.constant 0 : i32
    return %arg0, %arg1 : i32, i32
  }
  func.func @transform_7(%arg0: i32, %arg1: i32) -> (i32, i32) {
    %c0_i32 = arith.constant 0 : i32
    return %arg0, %arg1 : i32, i32
  }
}

</mosaic_0001>

<bundles_post_ra>
// kernel: tpu_custom_call.1
= control target key start
LH: loop header
LB: loop body
LE: loop exit
PB: predicated region body
PF: predicated region fallthrough
CT: control target
= control target key end

     0   :  { %13 = vsyncpa [#allocation3], 0  ;;  %s772_s0 = inlined_call_operand.hbm [shape: f32[8,128], index: 0, kind: input, shape index: {}]   ;;  %s773_s1 = inlined_call_operand.hbm [shape: f32[8,128], index: 1, kind: input, shape index: {}]   ;;  %s774_s2 = inlined_call_operand.hbm [shape: f32[128,512], index: 2, kind: input, shape index: {}]   ;;  %s775_s3 = inlined_call_operand.hbm [shape: f32[128,512], index: 3, kind: input, shape index: {}]   ;;  %s776_s4 = inlined_call_operand.hbm [shape: f32[1,512], index: 4, kind: input, shape index: {}]   ;;  %s777_s5 = inlined_call_operand.hbm [shape: f32[8,128], index: 5, kind: input, shape index: {}]   ;;  %s778_s6 = inlined_call_operand.hbm [shape: f32[8,128], index: 6, kind: output, shape index: {0}]   ;;  %s779_s7 = inlined_call_operand.hbm [shape: f32[8,128], index: 7, kind: output, shape index: {1}]  }
   0x1   :  { %14 = vsyncpa [#allocation6], 0 }
   0x2   :  { %15 = vsyncpa [#allocation9], 0 }
   0x3   :  { %16 = vsyncpa [#allocation12], 0 }
   0x4   :  { %17 = vsyncpa [#allocation4], 0  ;;  %s35_s26 = sshll.u32 %s773_s1, 4  ;;  %s36_s26 = int_to_ptr.hbm [resolvable:$true] %s35_s26 }
   0x5   :  { %18 = vsyncpa [#allocation15], 0  ;;  %s698_s27 = smov [#allocation5]   ;;  %s58_s8 = sshll.u32 %s775_s3, 4  ;;  %s59_s8 = int_to_ptr.hbm [resolvable:$true] %s58_s8 }
   0x6   :  { %s37_s28 = sshll.u32 %s698_s27, 4  ;;  %s699_s9 = smov [#allocation8]   ;;  %s38_s28 = int_to_ptr.vmem [resolvable:$true] %s37_s28 }
   0x7   :  { %40 = dma.hbm_to_vmem [thread:$0]  %s36_s26, 128, %s38_s28, [#allocation6]  }
   0x8   :  { %s60_s10 = sshll.u32 %s699_s9, 4  ;;  %s24_s13 = sshll.u32 %s772_s0, 4  ;;  %s61_s10 = int_to_ptr.vmem [resolvable:$true] %s60_s10  ;;  %s25_s13 = int_to_ptr.hbm [resolvable:$true] %s24_s13 }
   0x9   :  { %s700_s1 = smov 512   ;;  %s701_s14 = smov 32  }
   0xa   :  { %66 = dma.hbm_to_vmem [thread:$0]  %s59_s8, 8192, %s61_s10, [#allocation9], %s700_s1, %s700_s1, %s701_s14  }
   0xb   :  { %s45_s17 = sshll.u32 %s774_s2, 4  ;;  %s702_s18 = smov [#allocation2]   ;;  %s46_s17 = int_to_ptr.hbm [resolvable:$true] %s45_s17 }
   0xc   :  { %s26_s19 = sshll.u32 %s702_s18, 4  ;;  %s703_s3 = smov [#allocation7]   ;;  %s27_s19 = int_to_ptr.vmem [resolvable:$true] %s26_s19 }
   0xd   :  { %29 = dma.hbm_to_vmem [thread:$0]  %s25_s13, 128, %s27_s19, [#allocation3]  }
   0xe   :  { %s47_s20 = sshll.u32 %s703_s3, 4  ;;  %s72_s0 = sshll.u32 %s776_s4, 4  ;;  %s48_s20 = int_to_ptr.vmem [resolvable:$true] %s47_s20  ;;  %s73_s0 = int_to_ptr.hbm [resolvable:$true] %s72_s0 }
   0xf   :  { %53 = dma.hbm_to_vmem [thread:$0]  %s46_s17, 8192, %s48_s20, [#allocation6], %s700_s1, %s700_s1, %s701_s14  }
  0x10   :  { %s83_s25 = sshll.u32 %s777_s5, 4  ;;  %s704_s26 = smov [#allocation10]   ;;  %s84_s25 = int_to_ptr.hbm [resolvable:$true] %s83_s25 }
  0x11   :  { %s74_s2 = sshll.u32 %s704_s26, 4  ;;  %s705_s27 = smov [#allocation11]   ;;  %s75_s2 = int_to_ptr.vmem [resolvable:$true] %s74_s2 }
  0x12   :  { %77 = dma.hbm_to_vmem [thread:$0]  %s73_s0, 64, %s75_s2, [#allocation9]  }
  0x13   :  { %s85_s28 = sshll.u32 %s705_s27, 4  ;;  %s86_s28 = int_to_ptr.vmem [resolvable:$true] %s85_s28 }
  0x14   :  { %88 = dma.hbm_to_vmem [thread:$0]  %s84_s25, 128, %s86_s28, [#allocation12]  }
  0x15   :  { %686 = dma.done.wait [#allocation3], 128  }
  0x16   :  { %687 = vsyncadd [#allocation3], 4294967168 }
  0x17   :  { %688 = dma.done.wait [#allocation6], 8320  }
  0x18   :  { %689 = vsyncadd [#allocation6], 4294958976 }
  0x19   :  { %690 = dma.done.wait [#allocation9], 8256  }
  0x1a   :  { %691 = vsyncadd [#allocation9], 4294959040 }
  0x1b   :  { %692 = dma.done.wait [#allocation12], 128  }
  0x1c   :  { %693 = vsyncadd [#allocation12], 4294967168  ;;  %v239_v0 = vld [vmem:[#allocation8 + $0x1e0] sm:$0xff]  ;;  %v240_v1 = vld [vmem:[#allocation8 + $0x1e8] sm:$0xff]  ;;  %s706_s4 = smov [#allocation14]   ;;  %s456_s8 = sshll.u32 %s779_s7, 4  ;;  %s457_s8 = int_to_ptr.hbm [resolvable:$true] %s456_s8 }
  0x1d   :  { %v241_v2 = vld [vmem:[#allocation8 + $0x1f0] sm:$0xff]  ;;  %243 = vmatpush.msra.mxu0 %v239_v0  ;;  %263 = vmatpush.msra.mxu1 %v240_v1  ;;  %v242_v3 = vld [vmem:[#allocation8 + $0x1f8] sm:$0xff]  ;;  %v235_v4 = vld [vmem:[#allocation8 + $0x1c0] sm:$0xff]  ;;  %s454_s5 = sshll.u32 %s706_s4, 4  ;;  %s707_s9 = smov [#allocation13]   ;;  %s455_s5 = int_to_ptr.vmem [resolvable:$true] %s454_s5 }
  0x1e   :  { %v236_v5 = vld [vmem:[#allocation8 + $0x1c8] sm:$0xff]  ;;  %283 = vmatpush.msra.mxu2 %v241_v2  ;;  %303 = vmatpush.msra.mxu3 %v242_v3  ;;  %v237_v6 = vld [vmem:[#allocation8 + $0x1d0] sm:$0xff]  ;;  %v238_v7 = vld [vmem:[#allocation8 + $0x1d8] sm:$0xff]  ;;  %s443_s10 = sshll.u32 %s707_s9, 4  ;;  %s445_s13 = sshll.u32 %s778_s6, 4  ;;  %s444_s10 = int_to_ptr.vmem [resolvable:$true] %s443_s10  ;;  %s446_s13 = int_to_ptr.hbm [resolvable:$true] %s445_s13 }
  0x1f   :  { %v231_v8 = vld [vmem:[#allocation8 + $0x1a0] sm:$0xff]  ;;  %244 = vmatpush.msra.mxu0 %v235_v4  ;;  %264 = vmatpush.msra.mxu1 %v236_v5  ;;  %v232_v9 = vld [vmem:[#allocation8 + $0x1a8] sm:$0xff]  ;;  %v233_v10 = vld [vmem:[#allocation8 + $0x1b0] sm:$0xff] }
  0x20   :  { %v234_v11 = vld [vmem:[#allocation8 + $0x1b8] sm:$0xff]  ;;  %284 = vmatpush.msra.mxu2 %v237_v6  ;;  %304 = vmatpush.msra.mxu3 %v238_v7  ;;  %v227_v12 = vld [vmem:[#allocation8 + $0x180] sm:$0xff]  ;;  %v228_v13 = vld [vmem:[#allocation8 + $0x188] sm:$0xff] }
  0x21   :  { %245 = vmatpush.msra.mxu0 %v231_v8  ;;  %265 = vmatpush.msra.mxu1 %v232_v9  ;;  %v229_v14 = vld [vmem:[#allocation8 + $0x190] sm:$0xff]  ;;  %v230_v15 = vld [vmem:[#allocation8 + $0x198] sm:$0xff]  ;;  %v223_v16 = vld [vmem:[#allocation8 + $0x160] sm:$0xff] }
  0x22   :  { %285 = vmatpush.msra.mxu2 %v233_v10  ;;  %305 = vmatpush.msra.mxu3 %v234_v11  ;;  %v224_v17 = vld [vmem:[#allocation8 + $0x168] sm:$0xff]  ;;  %v225_v18 = vld [vmem:[#allocation8 + $0x170] sm:$0xff]  ;;  %v226_v19 = vld [vmem:[#allocation8 + $0x178] sm:$0xff] }
  0x23   :  { %246 = vmatpush.msra.mxu0 %v227_v12  ;;  %266 = vmatpush.msra.mxu1 %v228_v13  ;;  %v219_v20 = vld [vmem:[#allocation8 + $0x140] sm:$0xff]  ;;  %v220_v21 = vld [vmem:[#allocation8 + $0x148] sm:$0xff]  ;;  %v221_v22 = vld [vmem:[#allocation8 + $0x150] sm:$0xff] }
  0x24   :  { %286 = vmatpush.msra.mxu2 %v229_v14  ;;  %306 = vmatpush.msra.mxu3 %v230_v15  ;;  %v222_v23 = vld [vmem:[#allocation8 + $0x158] sm:$0xff]  ;;  %v215_v24 = vld [vmem:[#allocation8 + $0x120] sm:$0xff]  ;;  %v216_v25 = vld [vmem:[#allocation8 + $0x128] sm:$0xff] }
  0x25   :  { %247 = vmatpush.msra.mxu0 %v223_v16  ;;  %267 = vmatpush.msra.mxu1 %v224_v17  ;;  %v217_v26 = vld [vmem:[#allocation8 + $0x130] sm:$0xff]  ;;  %v218_v27 = vld [vmem:[#allocation8 + $0x138] sm:$0xff]  ;;  %v211_v28 = vld [vmem:[#allocation8 + $0x100] sm:$0xff] }
  0x26   :  { %287 = vmatpush.msra.mxu2 %v225_v18  ;;  %307 = vmatpush.msra.mxu3 %v226_v19  ;;  %v212_v29 = vld [vmem:[#allocation8 + $0x108] sm:$0xff]  ;;  %v213_v30 = vld [vmem:[#allocation8 + $0x110] sm:$0xff]  ;;  %v214_v31 = vld [vmem:[#allocation8 + $0x118] sm:$0xff] }
  0x27   :  { %248 = vmatpush.msra.mxu0 %v219_v20  ;;  %268 = vmatpush.msra.mxu1 %v220_v21  ;;  %v207_v32 = vld [vmem:[#allocation8 + $0xe0] sm:$0xff]  ;;  %v208_v33 = vld [vmem:[#allocation8 + $0xe8] sm:$0xff]  ;;  %v209_v34 = vld [vmem:[#allocation8 + $0xf0] sm:$0xff] }
  0x28   :  { %288 = vmatpush.msra.mxu2 %v221_v22  ;;  %308 = vmatpush.msra.mxu3 %v222_v23  ;;  %v210_v35 = vld [vmem:[#allocation8 + $0xf8] sm:$0xff]  ;;  %v203_v36 = vld [vmem:[#allocation8 + $0xc0] sm:$0xff]  ;;  %v204_v37 = vld [vmem:[#allocation8 + $0xc8] sm:$0xff] }
  0x29   :  { %249 = vmatpush.msra.mxu0 %v215_v24  ;;  %269 = vmatpush.msra.mxu1 %v216_v25  ;;  %v205_v38 = vld [vmem:[#allocation8 + $0xd0] sm:$0xff]  ;;  %v206_v39 = vld [vmem:[#allocation8 + $0xd8] sm:$0xff]  ;;  %v199_v40 = vld [vmem:[#allocation8 + $0xa0] sm:$0xff] }
  0x2a   :  { %289 = vmatpush.msra.mxu2 %v217_v26  ;;  %309 = vmatpush.msra.mxu3 %v218_v27  ;;  %v200_v41 = vld [vmem:[#allocation8 + $0xa8] sm:$0xff]  ;;  %v201_v42 = vld [vmem:[#allocation8 + $0xb0] sm:$0xff]  ;;  %v202_v43 = vld [vmem:[#allocation8 + $0xb8] sm:$0xff] }
  0x2b   :  { %250 = vmatpush.msra.mxu0 %v211_v28  ;;  %270 = vmatpush.msra.mxu1 %v212_v29  ;;  %v195_v44 = vld [vmem:[#allocation8 + $0x80] sm:$0xff]  ;;  %v196_v45 = vld [vmem:[#allocation8 + $0x88] sm:$0xff]  ;;  %v197_v46 = vld [vmem:[#allocation8 + $0x90] sm:$0xff] }
  0x2c   :  { %290 = vmatpush.msra.mxu2 %v213_v30  ;;  %310 = vmatpush.msra.mxu3 %v214_v31  ;;  %v198_v47 = vld [vmem:[#allocation8 + $0x98] sm:$0xff]  ;;  %v191_v48 = vld [vmem:[#allocation8 + $0x60] sm:$0xff]  ;;  %v192_v49 = vld [vmem:[#allocation8 + $0x68] sm:$0xff] }
  0x2d   :  { %251 = vmatpush.msra.mxu0 %v207_v32  ;;  %271 = vmatpush.msra.mxu1 %v208_v33  ;;  %v193_v50 = vld [vmem:[#allocation8 + $0x70] sm:$0xff]  ;;  %v194_v51 = vld [vmem:[#allocation8 + $0x78] sm:$0xff]  ;;  %v187_v52 = vld [vmem:[#allocation8 + $0x40] sm:$0xff] }
  0x2e   :  { %291 = vmatpush.msra.mxu2 %v209_v34  ;;  %311 = vmatpush.msra.mxu3 %v210_v35  ;;  %v188_v53 = vld [vmem:[#allocation8 + $0x48] sm:$0xff]  ;;  %v189_v54 = vld [vmem:[#allocation8 + $0x50] sm:$0xff]  ;;  %v190_v55 = vld [vmem:[#allocation8 + $0x58] sm:$0xff] }
  0x2f   :  { %252 = vmatpush.msra.mxu0 %v203_v36  ;;  %272 = vmatpush.msra.mxu1 %v204_v37  ;;  %v183_v56 = vld [vmem:[#allocation8 + $0x20] sm:$0xff]  ;;  %v184_v57 = vld [vmem:[#allocation8 + $0x28] sm:$0xff]  ;;  %v185_v58 = vld [vmem:[#allocation8 + $0x30] sm:$0xff] }
  0x30   :  { %292 = vmatpush.msra.mxu2 %v205_v38  ;;  %312 = vmatpush.msra.mxu3 %v206_v39  ;;  %v186_v59 = vld [vmem:[#allocation8 + $0x38] sm:$0xff]  ;;  %v179_v60 = vld [vmem:[#allocation8] sm:$0xff]  ;;  %v180_v61 = vld [vmem:[#allocation8 + $0x8] sm:$0xff] }
  0x31   :  { %253 = vmatpush.msra.mxu0 %v199_v40  ;;  %273 = vmatpush.msra.mxu1 %v200_v41  ;;  %v181_v62 = vld [vmem:[#allocation8 + $0x10] sm:$0xff]  ;;  %v182_v63 = vld [vmem:[#allocation8 + $0x18] sm:$0xff]  ;;  %v174_v0 = vld [vmem:[#allocation7 + $0x1e0] sm:$0xff] }
  0x32   :  { %293 = vmatpush.msra.mxu2 %v201_v42  ;;  %313 = vmatpush.msra.mxu3 %v202_v43  ;;  %v175_v1 = vld [vmem:[#allocation7 + $0x1e8] sm:$0xff]  ;;  %v176_v2 = vld [vmem:[#allocation7 + $0x1f0] sm:$0xff]  ;;  %v177_v3 = vld [vmem:[#allocation7 + $0x1f8] sm:$0xff] }
  0x33   :  { %254 = vmatpush.msra.mxu0 %v195_v44  ;;  %274 = vmatpush.msra.mxu1 %v196_v45  ;;  %v170_v4 = vld [vmem:[#allocation7 + $0x1c0] sm:$0xff]  ;;  %v171_v5 = vld [vmem:[#allocation7 + $0x1c8] sm:$0xff]  ;;  %v172_v6 = vld [vmem:[#allocation7 + $0x1d0] sm:$0xff] }
  0x34   :  { %294 = vmatpush.msra.mxu2 %v197_v46  ;;  %314 = vmatpush.msra.mxu3 %v198_v47  ;;  %v173_v7 = vld [vmem:[#allocation7 + $0x1d8] sm:$0xff]  ;;  %v166_v8 = vld [vmem:[#allocation7 + $0x1a0] sm:$0xff]  ;;  %v167_v9 = vld [vmem:[#allocation7 + $0x1a8] sm:$0xff] }
  0x35   :  { %255 = vmatpush.msra.mxu0 %v191_v48  ;;  %275 = vmatpush.msra.mxu1 %v192_v49  ;;  %v168_v10 = vld [vmem:[#allocation7 + $0x1b0] sm:$0xff]  ;;  %v169_v11 = vld [vmem:[#allocation7 + $0x1b8] sm:$0xff]  ;;  %v162_v12 = vld [vmem:[#allocation7 + $0x180] sm:$0xff] }
  0x36   :  { %295 = vmatpush.msra.mxu2 %v193_v50  ;;  %315 = vmatpush.msra.mxu3 %v194_v51  ;;  %v163_v13 = vld [vmem:[#allocation7 + $0x188] sm:$0xff]  ;;  %v164_v14 = vld [vmem:[#allocation7 + $0x190] sm:$0xff]  ;;  %v165_v15 = vld [vmem:[#allocation7 + $0x198] sm:$0xff] }
  0x37   :  { %256 = vmatpush.msra.mxu0 %v187_v52  ;;  %276 = vmatpush.msra.mxu1 %v188_v53  ;;  %v158_v16 = vld [vmem:[#allocation7 + $0x160] sm:$0xff]  ;;  %v159_v17 = vld [vmem:[#allocation7 + $0x168] sm:$0xff]  ;;  %v160_v18 = vld [vmem:[#allocation7 + $0x170] sm:$0xff] }
  0x38   :  { %296 = vmatpush.msra.mxu2 %v189_v54  ;;  %316 = vmatpush.msra.mxu3 %v190_v55  ;;  %v161_v19 = vld [vmem:[#allocation7 + $0x178] sm:$0xff]  ;;  %v154_v20 = vld [vmem:[#allocation7 + $0x140] sm:$0xff]  ;;  %v155_v21 = vld [vmem:[#allocation7 + $0x148] sm:$0xff] }
  0x39   :  { %257 = vmatpush.msra.mxu0 %v183_v56  ;;  %277 = vmatpush.msra.mxu1 %v184_v57  ;;  %v156_v22 = vld [vmem:[#allocation7 + $0x150] sm:$0xff]  ;;  %v157_v23 = vld [vmem:[#allocation7 + $0x158] sm:$0xff]  ;;  %v150_v24 = vld [vmem:[#allocation7 + $0x120] sm:$0xff] }
  0x3a   :  { %297 = vmatpush.msra.mxu2 %v185_v58  ;;  %317 = vmatpush.msra.mxu3 %v186_v59  ;;  %v151_v25 = vld [vmem:[#allocation7 + $0x128] sm:$0xff]  ;;  %v152_v26 = vld [vmem:[#allocation7 + $0x130] sm:$0xff]  ;;  %v153_v27 = vld [vmem:[#allocation7 + $0x138] sm:$0xff] }
  0x3b   :  { %258 = vmatpush.msra.mxu0 %v179_v60  ;;  %278 = vmatpush.msra.mxu1 %v180_v61  ;;  %v146_v28 = vld [vmem:[#allocation7 + $0x100] sm:$0xff]  ;;  %v147_v29 = vld [vmem:[#allocation7 + $0x108] sm:$0xff]  ;;  %v148_v30 = vld [vmem:[#allocation7 + $0x110] sm:$0xff] }
  0x3c   :  { %298 = vmatpush.msra.mxu2 %v181_v62  ;;  %318 = vmatpush.msra.mxu3 %v182_v63  ;;  %v149_v31 = vld [vmem:[#allocation7 + $0x118] sm:$0xff]  ;;  %v142_v32 = vld [vmem:[#allocation7 + $0xe0] sm:$0xff]  ;;  %v143_v33 = vld [vmem:[#allocation7 + $0xe8] sm:$0xff] }
  0x3d   :  { %323 = vmatpush.msrb.mxu0 %v174_v0  ;;  %343 = vmatpush.msrb.mxu1 %v175_v1  ;;  %v144_v34 = vld [vmem:[#allocation7 + $0xf0] sm:$0xff]  ;;  %v145_v35 = vld [vmem:[#allocation7 + $0xf8] sm:$0xff]  ;;  %v138_v36 = vld [vmem:[#allocation7 + $0xc0] sm:$0xff] }
  0x3e   :  { %363 = vmatpush.msrb.mxu2 %v176_v2  ;;  %383 = vmatpush.msrb.mxu3 %v177_v3  ;;  %v139_v37 = vld [vmem:[#allocation7 + $0xc8] sm:$0xff]  ;;  %v140_v38 = vld [vmem:[#allocation7 + $0xd0] sm:$0xff]  ;;  %v141_v39 = vld [vmem:[#allocation7 + $0xd8] sm:$0xff] }
  0x3f   :  { %324 = vmatpush.msrb.mxu0 %v170_v4  ;;  %344 = vmatpush.msrb.mxu1 %v171_v5  ;;  %v134_v40 = vld [vmem:[#allocation7 + $0xa0] sm:$0xff]  ;;  %v135_v41 = vld [vmem:[#allocation7 + $0xa8] sm:$0xff]  ;;  %v136_v42 = vld [vmem:[#allocation7 + $0xb0] sm:$0xff] }
  0x40   :  { %364 = vmatpush.msrb.mxu2 %v172_v6  ;;  %384 = vmatpush.msrb.mxu3 %v173_v7  ;;  %v137_v43 = vld [vmem:[#allocation7 + $0xb8] sm:$0xff]  ;;  %v130_v44 = vld [vmem:[#allocation7 + $0x80] sm:$0xff]  ;;  %v131_v45 = vld [vmem:[#allocation7 + $0x88] sm:$0xff] }
  0x41   :  { %325 = vmatpush.msrb.mxu0 %v166_v8  ;;  %345 = vmatpush.msrb.mxu1 %v167_v9  ;;  %v132_v46 = vld [vmem:[#allocation7 + $0x90] sm:$0xff]  ;;  %v133_v47 = vld [vmem:[#allocation7 + $0x98] sm:$0xff]  ;;  %v126_v49 = vld [vmem:[#allocation7 + $0x60] sm:$0xff] }
  0x42   :  { %365 = vmatpush.msrb.mxu2 %v168_v10  ;;  %385 = vmatpush.msrb.mxu3 %v169_v11  ;;  %v178_v48 = vld [vmem:[#allocation5] sm:$0xff]  ;;  %v127_v50 = vld [vmem:[#allocation7 + $0x68] sm:$0xff]  ;;  %v128_v51 = vld [vmem:[#allocation7 + $0x70] sm:$0xff] }
  0x43   :  { %326 = vmatpush.msrb.mxu0 %v162_v12  ;;  %346 = vmatpush.msrb.mxu1 %v163_v13  ;;  %v129_v52 = vld [vmem:[#allocation7 + $0x78] sm:$0xff]  ;;  %v122_v53 = vld [vmem:[#allocation7 + $0x40] sm:$0xff]  ;;  %v123_v54 = vld [vmem:[#allocation7 + $0x48] sm:$0xff] }
  0x44   :  { %366 = vmatpush.msrb.mxu2 %v164_v14  ;;  %386 = vmatpush.msrb.mxu3 %v165_v15  ;;  %v124_v55 = vld [vmem:[#allocation7 + $0x50] sm:$0xff]  ;;  %v125_v56 = vld [vmem:[#allocation7 + $0x58] sm:$0xff]  ;;  %v118_v57 = vld [vmem:[#allocation7 + $0x20] sm:$0xff] }
  0x45   :  { %327 = vmatpush.msrb.mxu0 %v158_v16  ;;  %347 = vmatpush.msrb.mxu1 %v159_v17  ;;  %v119_v58 = vld [vmem:[#allocation7 + $0x28] sm:$0xff]  ;;  %v120_v59 = vld [vmem:[#allocation7 + $0x30] sm:$0xff]  ;;  %v121_v60 = vld [vmem:[#allocation7 + $0x38] sm:$0xff] }
  0x46   :  { %367 = vmatpush.msrb.mxu2 %v160_v18  ;;  %387 = vmatpush.msrb.mxu3 %v161_v19  ;;  %v114_v61 = vld [vmem:[#allocation7] sm:$0xff]  ;;  %v115_v62 = vld [vmem:[#allocation7 + $0x8] sm:$0xff]  ;;  %v116_v63 = vld [vmem:[#allocation7 + $0x10] sm:$0xff] }
  0x47   :  { %328 = vmatpush.msrb.mxu0 %v154_v20  ;;  %348 = vmatpush.msrb.mxu1 %v155_v21  ;;  %v117_v0 = vld [vmem:[#allocation7 + $0x18] sm:$0xff]  ;;  %v113_v1 = vld [vmem:[#allocation2] sm:$0xff]  ;;  %v403_v4 = vld [vmem:[#allocation10] sm:$0xf] }
  0x48   :  { %368 = vmatpush.msrb.mxu2 %v156_v22  ;;  %388 = vmatpush.msrb.mxu3 %v157_v23  ;;  %v405_v7 = vperm.slane %v403_v4, 0  ;;  %v406_v8 = vperm.slane %v403_v4, 1  ;;  %v407_v17 = vperm.slane %v403_v4, 2  ;;  %v408_v18 = vperm.slane %v403_v4, 3 }
  0x49   :  { %329 = vmatpush.msrb.mxu0 %v150_v24  ;;  %349 = vmatpush.msrb.mxu1 %v151_v25 }
  0x4a   :  { %369 = vmatpush.msrb.mxu2 %v152_v26  ;;  %389 = vmatpush.msrb.mxu3 %v153_v27 }
  0x4b   :  { %330 = vmatpush.msrb.mxu0 %v146_v28  ;;  %350 = vmatpush.msrb.mxu1 %v147_v29 }
  0x4c   :  { %370 = vmatpush.msrb.mxu2 %v148_v30  ;;  %390 = vmatpush.msrb.mxu3 %v149_v31  ;;  %v430_v31 = vld [vmem:[#allocation11] sm:$0xff] }
  0x4d   :  { %331 = vmatpush.msrb.mxu0 %v142_v32  ;;  %351 = vmatpush.msrb.mxu1 %v143_v33 }
  0x4e   :  { %371 = vmatpush.msrb.mxu2 %v144_v34  ;;  %391 = vmatpush.msrb.mxu3 %v145_v35 }
  0x4f   :  { %332 = vmatpush.msrb.mxu0 %v138_v36  ;;  %352 = vmatpush.msrb.mxu1 %v139_v37 }
  0x50   :  { %372 = vmatpush.msrb.mxu2 %v140_v38  ;;  %392 = vmatpush.msrb.mxu3 %v141_v39 }
  0x51   :  { %333 = vmatpush.msrb.mxu0 %v134_v40  ;;  %353 = vmatpush.msrb.mxu1 %v135_v41 }
  0x52   :  { %373 = vmatpush.msrb.mxu2 %v136_v42  ;;  %393 = vmatpush.msrb.mxu3 %v137_v43 }
  0x53   :  { %334 = vmatpush.msrb.mxu0 %v130_v44  ;;  %354 = vmatpush.msrb.mxu1 %v131_v45 }
  0x54   :  { %374 = vmatpush.msrb.mxu2 %v132_v46  ;;  %394 = vmatpush.msrb.mxu3 %v133_v47 }
  0x55   :  { %259 = vmatmul.f32.vlgmr.msra.gmra.mxu0 %v178_v48  ;;  %279 = vmatmul.f32.vlgmr.msra.gmra.mxu1 %v178_v48 }
  0x56   :  { %299 = vmatmul.f32.vlgmr.msra.gmra.mxu2 %v178_v48  ;;  %319 = vmatmul.f32.vlgmr.msra.gmra.mxu3 %v178_v48 }
  0x57   :  { %335 = vmatpush.msrb.mxu0 %v126_v49  ;;  %355 = vmatpush.msrb.mxu1 %v127_v50 }
  0x58   :  { %375 = vmatpush.msrb.mxu2 %v128_v51  ;;  %395 = vmatpush.msrb.mxu3 %v129_v52 }
  0x59   :  { %336 = vmatpush.msrb.mxu0 %v122_v53  ;;  %356 = vmatpush.msrb.mxu1 %v123_v54 }
  0x5a   :  { %376 = vmatpush.msrb.mxu2 %v124_v55  ;;  %396 = vmatpush.msrb.mxu3 %v125_v56 }
  0x5b   :  { %337 = vmatpush.msrb.mxu0 %v118_v57  ;;  %357 = vmatpush.msrb.mxu1 %v119_v58 }
  0x5c   :  { %377 = vmatpush.msrb.mxu2 %v120_v59  ;;  %397 = vmatpush.msrb.mxu3 %v121_v60 }
  0x5d   :  { %338 = vmatpush.msrb.mxu0 %v114_v61  ;;  %358 = vmatpush.msrb.mxu1 %v115_v62 }
  0x5e   :  { %378 = vmatpush.msrb.mxu2 %v116_v63  ;;  %398 = vmatpush.msrb.mxu3 %v117_v0 }
  0x5f   :  { %339 = vmatmul.f32.vlgmr.msrb.gmra.mxu0 %v113_v1  ;;  %359 = vmatmul.f32.vlgmr.msrb.gmra.mxu1 %v113_v1 }
  0x60   :  { %379 = vmatmul.f32.vlgmr.msrb.gmra.mxu2 %v113_v1  ;;  %399 = vmatmul.f32.vlgmr.msrb.gmra.mxu3 %v113_v1 }
  0xd2   :  { %v260_v2 = vpop.f32.mrf.mxu0  ;;  %v280_v3 = vpop.f32.mrf.mxu1 }
  0xd9   :  { %v300_v5 = vpop.f32.mrf.mxu2  ;;  %v320_v6 = vpop.f32.mrf.mxu3 }
  0xdc   :  { %v340_v9 = vpop.f32.mrf.mxu0  ;;  %v360_v10 = vpop.f32.mrf.mxu1 }
  0xdd   :  { %v341_v11 = vadd.f32 %v340_v9, %v260_v2  ;;  %v361_v12 = vadd.f32 %v360_v10, %v280_v3 }
  0xdf   :  { %v413_v13 = vadd.f32 %v405_v7, %v341_v11  ;;  %v414_v14 = vadd.f32 %v406_v8, %v361_v12 }
  0xe1   :  { %v417_v15 = vmul.f32 0.5, %v413_v13  ;;  %v421_v16 = vmul.f32 0.5, %v414_v14 }
  0xe3   :  { %484 = vtanh.f32 %v417_v15  ;;  %v380_v19 = vpop.f32.mrf.mxu2  ;;  %v400_v20 = vpop.f32.mrf.mxu3 }
  0xe4   :  { %486 = vtanh.f32 %v421_v16  ;;  %v381_v21 = vadd.f32 %v380_v19, %v300_v5  ;;  %v401_v22 = vadd.f32 %v400_v20, %v320_v6 }
  0xe6   :  { %v415_v23 = vadd.f32 %v407_v17, %v381_v21  ;;  %v416_v24 = vadd.f32 %v408_v18, %v401_v22 }
  0xe8   :  { %488 = vtanh.f32 %v415_v23  ;;  %v425_v25 = vmul.f32 0.5, %v416_v24 }
  0xe9   :  { %v485_v26 = vpop.eup %484 }
  0xea   :  { %v487_v27 = vpop.eup %486  ;;  %v419_v28 = vmul.f32 0.5, %v485_v26  ;;  %490 = vtanh.f32 %v425_v25 }
  0xeb   :  { %v423_v29 = vmul.f32 0.5, %v487_v27 }
  0xec   :  { %v420_v30 = vadd.f32 0.5, %v419_v28 }
  0xed   :  { %v424_v32 = vadd.f32 0.5, %v423_v29 }
  0xee   :  { %v489_v33 = vpop.eup %488 }
  0xef   :  { %v431_v34 = vmul.f32 %v430_v31, %v424_v32  ;;  %v432_v35 = vmul.f32 %v489_v33, %v420_v30 }
  0xf0   :  { %v491_v36 = vpop.eup %490 }
  0xf1   :  { %v433_v37 = vadd.f32 %v432_v35, %v431_v34  ;;  %v427_v38 = vmul.f32 0.5, %v491_v36 }
  0xf3   :  { %437 = vst [vmem:[#allocation14] sm:$0xff] %v433_v37  ;;  %492 = vtanh.f32 %v433_v37  ;;  %v428_v39 = vadd.f32 0.5, %v427_v38 }
  0xf4   :  { %459 = dma.vmem_to_hbm [thread:$0]  %s455_s5, 128, %s457_s8, [#allocation15]  }
  0xf9   :  { %v493_v40 = vpop.eup %492 }
  0xfa   :  { %v435_v41 = vmul.f32 %v493_v40, %v428_v39 }
  0xfc   :  { %436 = vst [vmem:[#allocation13] sm:$0xff] %v435_v41 }
  0xfd   :  { %448 = dma.vmem_to_hbm [thread:$0]  %s444_s10, 128, %s446_s13, [#allocation4]  }
  0xfe   :  { %694 = dma.done.wait [#allocation4], 128  }
  0xff   :  { %695 = vsyncadd [#allocation4], 4294967168 }
 0x100   :  { %696 = dma.done.wait [#allocation15], 128  }
 0x101   :  { %697 = vsyncadd [#allocation15], 4294967168 }
 0x102   :  { %468 = vsyncpa [#allocation3], 1 }
 0x103   :  { %469 = vsyncpa [#allocation6], 1 }
 0x104   :  { %470 = vsyncpa [#allocation9], 1 }
 0x105   :  { %471 = vsyncpa [#allocation12], 1 }
 0x106   :  { %472 = vsyncpa [#allocation4], 1 }
 0x107   :  { %473 = vsyncpa [#allocation15], 1 }

</bundles_post_ra>
